<compile_context>
chip_gen: v7x
topology: tpu7x:2x2x1
jax: 0.10.0
libtpu: 0.0.40
codegen_flags: <defaults>
</compile_context>

<pallas_src>
import jax
import jax.numpy as jnp
from jax.experimental import pallas as pl
from jax.experimental.pallas import tpu as pltpu

DIM = 0                  # axis within the unit that index_select acts on
UNIT_SHAPE_LENGTH = 2    # unit tensors are 2-D: (N, D)

# Per-input-block VMEM budget (Pallas double-buffers input+output on top of
# this); conservative enough for v5e/v6e/v7x scoped-VMEM defaults.
_VMEM_BLOCK_BUDGET_BYTES = 2 * 1024 * 1024


def _round_up(x: int, m: int) -> int:
    return ((x + m - 1) // m) * m


def _select_even_rows_kernel(x_ref, o_ref):
    # x_ref: (TR, 2*D) — each row is an (even, odd) source-row pair.
    # o_ref: (TR, D)   — the even (selected) half of every pair.
    d = o_ref.shape[1]
    o_ref[...] = x_ref[:, :d]


def _select_even_rows(x2: jnp.ndarray, d: int) -> jnp.ndarray:
    """x2: (R, 2*D) pair-folded rows -> (R, D) selected (even) rows."""
    r, two_d = x2.shape
    itemsize = x2.dtype.itemsize
    # Row tile: as big as the budget allows, multiple of 8 (sublane tile).
    max_rows = max(8, (_VMEM_BLOCK_BUDGET_BYTES // (two_d * itemsize)) // 8 * 8)
    tr = min(_round_up(r, 8), max_rows)
    grid = (pl.cdiv(r, tr),)
    return pl.pallas_call(
        _select_even_rows_kernel,
        out_shape=jax.ShapeDtypeStruct((r, d), x2.dtype),
        grid=grid,
        in_specs=[pl.BlockSpec((tr, two_d), lambda i: (i, 0))],
        out_specs=pl.BlockSpec((tr, d), lambda i: (i, 0)),
        compiler_params=pltpu.CompilerParams(
            dimension_semantics=("parallel",),
            vmem_limit_bytes=32 * 1024 * 1024,
        ),
        cost_estimate=pl.CostEstimate(
            flops=0,
            transcendentals=0,
            bytes_accessed=r * (two_d + d) * itemsize,
        ),
    )(x2)


def filter_encoder_forward(x: jnp.ndarray) -> jnp.ndarray:
    """JAX/Pallas equivalent of FilterEncoder.forward (dim=0, unit_shape_length=2)."""
    ndim = x.ndim
    if ndim not in (UNIT_SHAPE_LENGTH,
                    UNIT_SHAPE_LENGTH + 1,
                    UNIT_SHAPE_LENGTH + 2):
        raise ValueError(
            f"expected rank in {{{UNIT_SHAPE_LENGTH}, "
            f"{UNIT_SHAPE_LENGTH + 1}, {UNIT_SHAPE_LENGTH + 2}}}, got {ndim}")
    n, d = x.shape[-2], x.shape[-1]
    k = (n + 1) // 2          # == len(arange(0, n, 2)): static even-row filter
    batch_shape = x.shape[:-2]
    b = 1
    for s in batch_shape:
        b *= s

    x3 = x.reshape((b, n, d))
    if n % 2:
        # Pad one dummy row so row pairs fold cleanly; the pad lands in the
        # (dropped) odd slot of the last pair and is never selected.
        x3 = jnp.pad(x3, ((0, 0), (0, 1), (0, 0)))
    # Free, contiguous reshape: fold (even, odd) row pairs into the lane axis.
    x2 = x3.reshape((b * k, 2 * d))

    out2 = _select_even_rows(x2, d)
    return out2.reshape(batch_shape + (k, d))


if __name__ == "__main__":
    key = jax.random.PRNGKey(0)

    # double-batch case (unit_shape_length + 2): vmap(vmap(select_single))
    x = jax.random.normal(key, (2, 4, 16, 16), dtype=jnp.float32)

    out = filter_encoder_forward(x)
    out = jax.block_until_ready(out)

    # reference: index_select along unit dim 0 with the deterministic filter
    ref = x[..., ::2, :]
    assert out.shape == ref.shape, (out.shape, ref.shape)
    assert jnp.allclose(out, ref), "mismatch vs reference gather"

    # also exercise the single-unit and single-batch dispatch branches
    out1 = jax.block_until_ready(filter_encoder_forward(x[0, 0]))
    assert out1.shape == (8, 16)
    assert jnp.allclose(out1, x[0, 0, ::2, :])
    out2 = jax.block_until_ready(filter_encoder_forward(x[0]))
    assert out2.shape == (4, 8, 16)
    assert jnp.allclose(out2, x[0, :, ::2, :])

    print("KERNEL_OK")
</pallas_src>

<mosaic_0001>
module attributes {stable_mosaic.version = 11 : i64} {
  func.func @_select_even_rows_kernel(%arg0: i32, %arg1: memref<64x32xf32, #tpu.memory_space<vmem>>, %arg2: memref<64x16xf32, #tpu.memory_space<vmem>>) attributes {dimension_semantics = [#tpu.dimension_semantics<parallel>], iteration_bounds = array<i64: 1>, scalar_prefetch = 0 : i64, scratch_operands = 0 : i64, tpu.core_type = #tpu.core_type<tc>, window_params = [{transform_indices = @transform_0, window_bounds = array<i64: 64, 32>}, {transform_indices = @transform_1, window_bounds = array<i64: 64, 16>}]} {
    %c0 = arith.constant 0 : index
    %c0_0 = arith.constant 0 : index
    %0 = vector.load %arg1[%c0, %c0_0] : memref<64x32xf32, #tpu.memory_space<vmem>>, vector<64x16xf32>
    %c0_1 = arith.constant 0 : index
    %c0_2 = arith.constant 0 : index
    %1 = vector.load %arg2[%c0_1, %c0_2] : memref<64x16xf32, #tpu.memory_space<vmem>>, vector<64x16xf32>
    tpu.vector_store %arg2[%c0_1, %c0_2], %0 {strides = array<i32>} : memref<64x16xf32, #tpu.memory_space<vmem>>, vector<64x16xf32>,
    return
  }
  func.func @transform_0(%arg0: i32) -> (i32, i32) {
    %c0_i32 = arith.constant 0 : i32
    %c0_i32_0 = arith.constant 0 : i32
    return %arg0, %c0_i32 : i32, i32
  }
  func.func @transform_1(%arg0: i32) -> (i32, i32) {
    %c0_i32 = arith.constant 0 : i32
    %c0_i32_0 = arith.constant 0 : i32
    return %arg0, %c0_i32 : i32, i32
  }
}

</mosaic_0001>

<bundles_post_ra>
// kernel: tpu_custom_call.1
= control target key start
LH: loop header
LB: loop body
LE: loop exit
PB: predicated region body
PF: predicated region fallthrough
CT: control target
= control target key end

     0   :  { %vm16_vm0 = vcmask 130048   ;;  %s95_s0 = inlined_call_operand.vmem [shape: f32[64,32], index: 0, kind: input, shape index: {}]   ;;  %s96_s1 = inlined_call_operand.vmem [shape: f32[64,16], index: 1, kind: output, shape index: {}]  }
   0x1   :  { %v8_v0 = vld [vmem:[%s95_s0] sm:$0xff]  ;;  %v9_v1 = vld [vmem:[%s95_s0 + $0x8] sm:$0xff]  ;;  %v10_v2 = vld [vmem:[%s95_s0 + $0x10] sm:$0xff] }
   0x2   :  { %17 = vst.msk [vmem:[%s96_s1] sm:$0xff] %vm16_vm0, %v8_v0  ;;  %18 = vst.msk [vmem:[%s96_s1 + $0x8] sm:$0xff] %vm16_vm0, %v9_v1  ;;  %v11_v3 = vld [vmem:[%s95_s0 + $0x18] sm:$0xff]  ;;  %v12_v4 = vld [vmem:[%s95_s0 + $0x20] sm:$0xff] }
   0x3   :  { %19 = vst.msk [vmem:[%s96_s1 + $0x10] sm:$0xff] %vm16_vm0, %v10_v2  ;;  %v13_v5 = vld [vmem:[%s95_s0 + $0x28] sm:$0xff]  ;;  %20 = vst.msk [vmem:[%s96_s1 + $0x18] sm:$0xff] %vm16_vm0, %v11_v3  ;;  %v14_v6 = vld [vmem:[%s95_s0 + $0x30] sm:$0xff] }
   0x4   :  { %21 = vst.msk [vmem:[%s96_s1 + $0x20] sm:$0xff] %vm16_vm0, %v12_v4  ;;  %22 = vst.msk [vmem:[%s96_s1 + $0x28] sm:$0xff] %vm16_vm0, %v13_v5  ;;  %v15_v7 = vld [vmem:[%s95_s0 + $0x38] sm:$0xff] }
   0x5   :  { %23 = vst.msk [vmem:[%s96_s1 + $0x30] sm:$0xff] %vm16_vm0, %v14_v6  ;;  %24 = vst.msk [vmem:[%s96_s1 + $0x38] sm:$0xff] %vm16_vm0, %v15_v7 }

</bundles_post_ra>
